<compile_context>
chip_gen: v6e
topology: v6e:2x2x1
jax: 0.10.0
libtpu: 0.0.40
codegen_flags: <defaults>
</compile_context>

<pallas_src>
import functools

import jax
import jax.numpy as jnp
import numpy as np
from jax import lax
from jax.experimental import pallas as pl
from jax.experimental.pallas import tpu as pltpu


def _round_up(x, m):
    return ((x + m - 1) // m) * m


def _afford_kernel(occ_ref, lhs_ref, p2p_ref, out_ref,
                   res_acc, pred_acc, cnt_acc, *, batch, v_tile):
    v = pl.program_id(0)                 # view index          (reduction axis)
    c = pl.program_id(1)                 # pixel-chunk index   (reduction axis)
    t = pl.program_id(2)                 # point-tile index
    n_c = pl.num_programs(1)
    n_t = pl.num_programs(2)

    start = t * v_tile                                   # first point id of tile
    cols = pl.ds(pl.multiple_of(start, 128), v_tile)     # lane-aligned column slice

    # Reset cross-view accumulators for this point tile at its very first step.
    @pl.when((v == 0) & (c == 0))
    def _():
        pred_acc[:, cols] = jnp.zeros((pred_acc.shape[0], v_tile), jnp.float32)
        cnt_acc[:, cols] = jnp.zeros((1, v_tile), jnp.float32)

    # Reset this view's vote/count accumulator for this tile at its first chunk.
    @pl.when(c == 0)
    def _():
        res_acc[:, cols] = jnp.zeros((res_acc.shape[0], v_tile), jnp.float32)

    # Occupancy gate: only build the one-hot / run the MXU if this pixel chunk
    # contains at least one point id that falls inside this point tile.
    occ_idx = (v * n_c + c) * n_t + t

    @pl.when(occ_ref[occ_idx] != 0)
    def _():
        lhs_c = lhs_ref[0]                               # (B+1, pix_chunk)
        pid_row = p2p_ref[0]                             # (1,   pix_chunk) int32
        # (v_tile, 1) iota broadcast against the (1, chunk) id row: invalid ids
        # (-1) and ids outside this tile never match -> mask is free.
        iota_col = lax.broadcasted_iota(jnp.int32, (v_tile, 1), 0) + start
        onehot_t = (pid_row == iota_col).astype(lhs_c.dtype)   # (v_tile, chunk)
        # rows 0..B-1 -> per-batch vote sums, row B (ones row) -> pixel counts.
        res_acc[:, cols] += lax.dot_general(
            lhs_c, onehot_t,
            dimension_numbers=(((1,), (1,)), ((), ())),   # NT: contract pixels
            preferred_element_type=jnp.float32)

    # Per-view finalize after the last pixel chunk: average this view's votes
    # and fold into the cross-view accumulators (exact divides).
    @pl.when(c == n_c - 1)
    def _():
        votes = res_acc[:batch, cols]                    # (B, v_tile)
        counts = res_acc[batch:batch + 1, cols]          # (1, v_tile)
        has = counts > 0.0
        view_avg = jnp.where(has, votes / jnp.where(has, counts, 1.0), 0.0)
        pred_acc[:, cols] += view_avg
        cnt_acc[:, cols] += has.astype(jnp.float32)

    # Final output after the last view's last chunk: divide by the number of
    # views that actually saw each point.
    @pl.when((v == pl.num_programs(0) - 1) & (c == n_c - 1))
    def _():
        cnt = cnt_acc[:, cols]
        ok = cnt > 0.0
        out_ref[...] = jnp.where(
            ok, pred_acc[:, cols] / jnp.where(ok, cnt, 1.0), 0.0
        ).astype(out_ref.dtype)


def pack_point_map(pixel_to_point_map, pix_pad):
    """(C, H, W) int -> (C, 1, pix_pad) int32, lane-dense in pixels.

    Padded pixels get id -1 so they contribute nothing.  This is constant
    per-dataset metadata: compute once at init and reuse across calls.
    """
    C = pixel_to_point_map.shape[0]
    p2p = pixel_to_point_map.astype(jnp.int32).reshape(C, -1)
    pix = p2p.shape[1]
    if pix_pad > pix:
        p2p = jnp.concatenate(
            [p2p, jnp.full((C, pix_pad - pix), -1, jnp.int32)], axis=1)
    return p2p.reshape(C, 1, pix_pad)


def compute_occupancy(p2p_col, n_chunks, pix_chunk, n_vt, v_tile):
    """occ[(v, chunk, tile)] = 1 iff that pixel chunk has an id in that tile.

    Flattened to 1-D int32 (SMEM-friendly).  Like the p2p map itself this is
    constant metadata -- compute once at init for a fixed tiling.
    """
    C = p2p_col.shape[0]
    pid = p2p_col.reshape(C * n_chunks, pix_chunk)
    # -1 (invalid) -> bucket n_vt; ids beyond the padded point range fall out
    # of bounds and are dropped (they are also dropped by the kernel's iota).
    tile_of = jnp.where(pid >= 0, pid // v_tile, n_vt).astype(jnp.int32)
    rows = jnp.arange(C * n_chunks, dtype=jnp.int32)[:, None]
    hist = jnp.zeros((C * n_chunks, n_vt + 1), jnp.int32)
    hist = hist.at[rows, tile_of].add(1, mode="drop")
    occ = (hist[:, :n_vt] > 0).astype(jnp.int32)
    return occ.reshape(-1)                       # index = (v*n_chunks + c)*n_vt + t


def object_pc_afford_3d_predict(seg_maps, pixel_to_point_map, *, num_points,
                                v_tile=512, pix_chunk=2048,
                                compute_dtype=jnp.float32):
    """seg_maps: (B, C_views, H, W) float. pixel_to_point_map: (C_views, H, W)
    int point ids, -1 = pixel not covered. Returns (B, num_points) float32.

    Tuning notes (per TPU generation):
      * v5e/v6e (128 MiB VMEM): v_tile -> 1024-2048, pix_chunk -> 4096-8192 and
        vmem_limit_bytes up to ~96 MiB cut grid-step overhead further (the
        one-hot temp is v_tile*pix_chunk*4 B for f32 / *2 B for bf16).
      * v7x (64 MiB VMEM, 2 TCs): keep the defaults and vmem_limit <= ~32-48 MiB;
        the point-tile axis can be marked "parallel" (after verifying trailing-
        parallel megacore sharding) -- left "arbitrary" here for portability.
      * More LHS rows (more batches / timesteps stacked) are nearly free: the
        one-hot build and its MXU ingest are independent of the row count.

    Host-side parts of the PyTorch module with no device equivalent:
      * ds_names filtering ('oafford' not in name -> skip batch) is equivalent
        to zeroing that batch's seg maps before the call (output row stays 0).
      * per-view np.load of the p2pmap .npz -> the map is passed in as an array.
    Behavior deltas vs the PyTorch reference (documented, not bugs):
      * point ids >= num_points are silently dropped (torch would index-error).
      * f32 accumulation order differs (per-chunk MXU partials), ~1e-6 rel.
      * if the backend routes f32 MXU matmuls through bf16 passes, seg votes
        see up to ~2^-9 relative rounding (counts / one-hot stay exact).
    """
    # TODO(synk): multiview_channels == 1 (grid format) path is deprecated upstream; not implemented.
    B, C, H, W = seg_maps.shape
    assert pixel_to_point_map.shape == (C, H, W)
    PIX = H * W

    # --- tiling ---------------------------------------------------------------
    np_pad = _round_up(num_points, 128)              # lane-dense output columns
    v_tile = max(128, (min(v_tile, np_pad) // 128) * 128)
    while np_pad % v_tile:                           # v_tile must divide padded pts
        v_tile -= 128
    n_vt = np_pad // v_tile

    pix_chunk = max(128, (pix_chunk // 128) * 128)
    pix_chunk = min(pix_chunk, _round_up(PIX, 128))
    pix_pad = _round_up(PIX, pix_chunk)              # padded pixels (id=-1) no-op
    n_chunks = pix_pad // pix_chunk

    # --- constant per-view metadata (compute once at init in production) ------
    p2p_col = pack_point_map(pixel_to_point_map, pix_pad)        # (C, 1, pix_pad)
    occ = compute_occupancy(p2p_col, n_chunks, pix_chunk, n_vt, v_tile)

    # --- LHS: B seg rows + 1 ones row (counts); no sublane zero-padding -------
    seg_t = jnp.transpose(
        seg_maps.reshape(B, C, PIX).astype(compute_dtype), (1, 0, 2))  # (C,B,PIX)
    ones_row = jnp.ones((C, 1, PIX), compute_dtype)
    lhs = jnp.concatenate([seg_t, ones_row], axis=1)              # (C, B+1, PIX)
    if pix_pad > PIX:
        lhs = jnp.concatenate(
            [lhs, jnp.zeros((C, B + 1, pix_pad - PIX), compute_dtype)], axis=2)

    kernel = functools.partial(_afford_kernel, batch=B, v_tile=v_tile)

    out = pl.pallas_call(
        kernel,
        out_shape=jax.ShapeDtypeStruct((B, np_pad), jnp.float32),
        grid_spec=pltpu.PrefetchScalarGridSpec(
            num_scalar_prefetch=1,                   # occupancy table -> SMEM
            grid=(C, n_chunks, n_vt),                # views / pixel chunks / tiles
            in_specs=[
                # seg rows + ones row for view v, pixel chunk c (fetched once
                # per (v, c); the inner point-tile axis reuses the same block).
                pl.BlockSpec((1, B + 1, pix_chunk), lambda v, c, t, occ: (v, 0, c)),
                # pixel -> point id row for view v, pixel chunk c.
                pl.BlockSpec((1, 1, pix_chunk), lambda v, c, t, occ: (v, 0, c)),
            ],
            out_specs=pl.BlockSpec((B, v_tile), lambda v, c, t, occ: (0, t)),
            scratch_shapes=[
                pltpu.VMEM((B + 1, np_pad), jnp.float32),  # per-view votes + counts
                pltpu.VMEM((B, np_pad), jnp.float32),      # sum of per-view averages
                pltpu.VMEM((1, np_pad), jnp.float32),      # per-point view count
            ],
        ),
        compiler_params=pltpu.CompilerParams(
            # All axes are reductions / revisited-output axes; on v7x the last
            # axis can be flipped to "parallel" for 2-TC sharding.
            dimension_semantics=("arbitrary", "arbitrary", "arbitrary"),
            vmem_limit_bytes=32 * 1024 * 1024),
    )(occ, lhs, p2p_col)
    return out[:, :num_points]


def _reference(seg, p2p, num_points):
    """Pure numpy replica of ObjectPCAfford3DPredictor.forward."""
    B, C, H, W = seg.shape
    pred = np.zeros((B, num_points), np.float32)
    vcount = np.zeros((B, num_points), np.float32)
    for b in range(B):
        for v in range(C):
            m = p2p[v]
            valid = m != -1
            pts = m[valid].astype(np.int64)
            vals = seg[b, v][valid].astype(np.float32)
            votes = np.zeros(num_points, np.float32)
            counts = np.zeros(num_points, np.float32)
            np.add.at(votes, pts, vals)
            np.add.at(counts, pts, 1.0)
            ok = counts > 0
            votes[ok] /= counts[ok]
            pred[b] += votes
            vcount[b] += ok.astype(np.float32)
    ok = vcount > 0
    pred[ok] /= vcount[ok]
    return pred


if __name__ == "__main__":
    key = jax.random.PRNGKey(0)
    B, C, H, W = 2, 4, 16, 16
    num_points = 2048            # module default -> 4 point tiles of 512

    k1, k2 = jax.random.split(key)
    seg_f32 = jax.random.uniform(k1, (B, C, H, W), jnp.float32)
    # Per-view pixel->point map; -1 marks uncovered pixels.  Ids drawn from a
    # subset of points so multi-pixel averaging, never-seen points and the
    # occupancy skip (3 of 4 point tiles empty) are all exercised.
    p2p = jax.random.randint(k2, (C, H, W), -1, 512, dtype=jnp.int32)

    # Check 1: algorithm check at tight tolerance with bf16-representable seg
    # values (exact regardless of how the MXU handles f32 multiplier passes).
    seg_q = seg_f32.astype(jnp.bfloat16).astype(jnp.float32)
    out_q = jax.block_until_ready(
        object_pc_afford_3d_predict(seg_q, p2p, num_points=num_points))
    ref_q = _reference(np.asarray(seg_q), np.asarray(p2p), num_points)
    assert out_q.shape == (B, num_points)
    assert np.allclose(np.asarray(out_q), ref_q, atol=1e-5, rtol=1e-5), \
        "mismatch vs numpy reference (bf16-exact inputs)"

    # Check 2: raw f32 seg values.  Typically ~1e-6 off the reference; the
    # looser tolerance also covers backends whose default f32 MXU matmul runs
    # bf16 multiplier passes (documented in the wrapper docstring).
    out_f = jax.block_until_ready(
        object_pc_afford_3d_predict(seg_f32, p2p, num_points=num_points))
    ref_f = _reference(np.asarray(seg_f32), np.asarray(p2p), num_points)
    assert np.allclose(np.asarray(out_f), ref_f, atol=5e-3, rtol=5e-3), \
        "mismatch vs numpy reference (f32 inputs)"

    print("KERNEL_OK")
</pallas_src>

<mosaic_0001>
module attributes {stable_mosaic.version = 11 : i64} {
  func.func @_afford_kernel(%arg0: i32, %arg1: i32, %arg2: i32, %arg3: memref<16xi32, #tpu.memory_space<smem>>, %arg4: memref<1x3x256xf32, #tpu.memory_space<vmem>>, %arg5: memref<1x1x256xi32, #tpu.memory_space<vmem>>, %arg6: memref<2x512xf32, #tpu.memory_space<vmem>>, %arg7: memref<3x2048xf32, #tpu.memory_space<vmem>>, %arg8: memref<2x2048xf32, #tpu.memory_space<vmem>>, %arg9: memref<1x2048xf32, #tpu.memory_space<vmem>>) attributes {dimension_semantics = [#tpu.dimension_semantics<arbitrary>, #tpu.dimension_semantics<arbitrary>, #tpu.dimension_semantics<arbitrary>], iteration_bounds = array<i64: 4, 1, 4>, scalar_prefetch = 1 : i64, scratch_operands = 3 : i64, tpu.core_type = #tpu.core_type<tc>, window_params = [{transform_indices = @transform_0, window_bounds = array<i64: 1, 3, 256>}, {transform_indices = @transform_1, window_bounds = array<i64: 1, 1, 256>}, {transform_indices = @transform_2, window_bounds = array<i64: 2, 512>}]} {
    %c512_i32 = arith.constant 512 : i32
    %0 = arith.muli %arg2, %c512_i32 : i32
    %1 = tpu.assume_multiple %0, 128 : i32
    %c0_i32 = arith.constant 0 : i32
    %2 = arith.cmpi eq, %arg0, %c0_i32 : i32
    %c0_i32_0 = arith.constant 0 : i32
    %3 = arith.cmpi eq, %arg1, %c0_i32_0 : i32
    %4 = arith.andi %2, %3 : i1
    %5 = arith.extui %4 : i1 to i32
    %c0_i32_1 = arith.constant 0 : i32
    %6 = arith.cmpi ne, %5, %c0_i32_1 : i32
    scf.if %6 {
      %cst = arith.constant 0.000000e+00 : f32
      %27 = vector.broadcast %cst : f32 to vector<2x512xf32>
      %c0 = arith.constant 0 : index
      %28 = arith.index_cast %1 : i32 to index
      %29 = vector.load %arg8[%c0, %28] : memref<2x2048xf32, #tpu.memory_space<vmem>>, vector<2x512xf32>
      tpu.vector_store %arg8[%c0, %28], %27 {strides = array<i32>} : memref<2x2048xf32, #tpu.memory_space<vmem>>, vector<2x512xf32>,
      %cst_10 = arith.constant 0.000000e+00 : f32
      %30 = vector.broadcast %cst_10 : f32 to vector<1x512xf32>
      %c0_11 = arith.constant 0 : index
      %31 = arith.index_cast %1 : i32 to index
      %32 = vector.load %arg9[%c0_11, %31] : memref<1x2048xf32, #tpu.memory_space<vmem>>, vector<1x512xf32>
      tpu.vector_store %arg9[%c0_11, %31], %30 {strides = array<i32>} : memref<1x2048xf32, #tpu.memory_space<vmem>>, vector<1x512xf32>,
    } else {
    }
    %c0_i32_2 = arith.constant 0 : i32
    %7 = arith.cmpi eq, %arg1, %c0_i32_2 : i32
    %8 = arith.extui %7 : i1 to i32
    %c0_i32_3 = arith.constant 0 : i32
    %9 = arith.cmpi ne, %8, %c0_i32_3 : i32
    scf.if %9 {
      %cst = arith.constant 0.000000e+00 : f32
      %27 = vector.broadcast %cst : f32 to vector<3x512xf32>
      %c0 = arith.constant 0 : index
      %28 = arith.index_cast %1 : i32 to index
      %29 = vector.load %arg7[%c0, %28] : memref<3x2048xf32, #tpu.memory_space<vmem>>, vector<3x512xf32>
      tpu.vector_store %arg7[%c0, %28], %27 {strides = array<i32>} : memref<3x2048xf32, #tpu.memory_space<vmem>>, vector<3x512xf32>,
    } else {
    }
    %c1_i32 = arith.constant 1 : i32
    %10 = arith.muli %arg0, %c1_i32 : i32
    %11 = arith.addi %10, %arg1 : i32
    %c4_i32 = arith.constant 4 : i32
    %12 = arith.muli %11, %c4_i32 : i32
    %13 = arith.addi %12, %arg2 : i32
    %14 = arith.index_cast %13 : i32 to index
    %15 = memref.load %arg3[%14] : memref<16xi32, #tpu.memory_space<smem>>
    %c0_i32_4 = arith.constant 0 : i32
    %16 = arith.cmpi ne, %15, %c0_i32_4 : i32
    %17 = arith.extui %16 : i1 to i32
    %c0_i32_5 = arith.constant 0 : i32
    %18 = arith.cmpi ne, %17, %c0_i32_5 : i32
    scf.if %18 {
      %c0 = arith.constant 0 : index
      %c0_10 = arith.constant 0 : index
      %c0_11 = arith.constant 0 : index
      %27 = vector.load %arg4[%c0, %c0_10, %c0_11] : memref<1x3x256xf32, #tpu.memory_space<vmem>>, vector<1x3x256xf32>
      %28 = vector.shape_cast %27 : vector<1x3x256xf32> to vector<3x256xf32>
      %c0_12 = arith.constant 0 : index
      %c0_13 = arith.constant 0 : index
      %c0_14 = arith.constant 0 : index
      %29 = vector.load %arg5[%c0_12, %c0_13, %c0_14] : memref<1x1x256xi32, #tpu.memory_space<vmem>>, vector<1x1x256xi32>
      %30 = vector.shape_cast %29 : vector<1x1x256xi32> to vector<1x256xi32>
      %31 = tpu.iota {dimensions = array<i32: 0>} : vector<512x1xi32>
      %32 = vector.broadcast %0 : i32 to vector<512x1xi32>
      %33 = arith.addi %31, %32 : vector<512x1xi32>
      %34 = vector.broadcast %30 : vector<1x256xi32> to vector<512x256xi32>
      %35 = vector.broadcast %33 : vector<512x1xi32> to vector<512x256xi32>
      %36 = arith.cmpi eq, %34, %35 : vector<512x256xi32>
      %37 = arith.extui %36 : vector<512x256xi1> to vector<512x256xi32>
      %38 = arith.sitofp %37 : vector<512x256xi32> to vector<512x256xf32>
      %c0_15 = arith.constant 0 : index
      %39 = arith.index_cast %1 : i32 to index
      %40 = vector.load %arg7[%c0_15, %39] : memref<3x2048xf32, #tpu.memory_space<vmem>>, vector<3x512xf32>
      %cst = arith.constant dense<0.000000e+00> : vector<3x512xf32>
      %41 = tpu.matmul %28, %38, %cst {dimension_numbers = #tpu.dot_dimension_numbers<[1], [1], [0], [0], [0, 0, 1, 0], [], []>} : vector<3x256xf32>, vector<512x256xf32>, vector<3x512xf32> -> vector<3x512xf32>
      %42 = arith.addf %40, %41 : vector<3x512xf32>
      %c0_16 = arith.constant 0 : index
      %43 = arith.index_cast %1 : i32 to index
      %44 = vector.load %arg7[%c0_16, %43] : memref<3x2048xf32, #tpu.memory_space<vmem>>, vector<3x512xf32>
      tpu.vector_store %arg7[%c0_16, %43], %42 {strides = array<i32>} : memref<3x2048xf32, #tpu.memory_space<vmem>>, vector<3x512xf32>,
    } else {
    }
    %c0_i32_6 = arith.constant 0 : i32
    %19 = arith.cmpi eq, %arg1, %c0_i32_6 : i32
    %20 = arith.extui %19 : i1 to i32
    %c0_i32_7 = arith.constant 0 : i32
    %21 = arith.cmpi ne, %20, %c0_i32_7 : i32
    scf.if %21 {
      %c0 = arith.constant 0 : index
      %27 = arith.index_cast %1 : i32 to index
      %28 = vector.load %arg7[%c0, %27] : memref<3x2048xf32, #tpu.memory_space<vmem>>, vector<2x512xf32>
      %c2 = arith.constant 2 : index
      %29 = arith.index_cast %1 : i32 to index
      %30 = vector.load %arg7[%c2, %29] : memref<3x2048xf32, #tpu.memory_space<vmem>>, vector<1x512xf32>
      %cst = arith.constant 0.000000e+00 : f32
      %31 = vector.broadcast %cst : f32 to vector<1x512xf32>
      %32 = arith.cmpf ogt, %30, %31 : vector<1x512xf32>
      %cst_10 = arith.constant 1.000000e+00 : f32
      %33 = vector.broadcast %cst_10 : f32 to vector<1x512xf32>
      %34 = arith.select %32, %30, %33 : vector<1x512xi1>, vector<1x512xf32>
      %35 = vector.broadcast %34 : vector<1x512xf32> to vector<2x512xf32>
      %36 = arith.divf %28, %35 : vector<2x512xf32>
      %cst_11 = arith.constant 0.000000e+00 : f32
      %37 = vector.shape_cast %32 : vector<1x512xi1> to vector<1x512xi1>
      %38 = vector.broadcast %37 : vector<1x512xi1> to vector<2x512xi1>
      %39 = vector.broadcast %cst_11 : f32 to vector<2x512xf32>
      %40 = arith.select %38, %36, %39 : vector<2x512xi1>, vector<2x512xf32>
      %c0_12 = arith.constant 0 : index
      %41 = arith.index_cast %1 : i32 to index
      %42 = vector.load %arg8[%c0_12, %41] : memref<2x2048xf32, #tpu.memory_space<vmem>>, vector<2x512xf32>
      %43 = arith.addf %42, %40 : vector<2x512xf32>
      %c0_13 = arith.constant 0 : index
      %44 = arith.index_cast %1 : i32 to index
      %45 = vector.load %arg8[%c0_13, %44] : memref<2x2048xf32, #tpu.memory_space<vmem>>, vector<2x512xf32>
      tpu.vector_store %arg8[%c0_13, %44], %43 {strides = array<i32>} : memref<2x2048xf32, #tpu.memory_space<vmem>>, vector<2x512xf32>,
      %c0_14 = arith.constant 0 : index
      %46 = arith.index_cast %1 : i32 to index
      %47 = vector.load %arg9[%c0_14, %46] : memref<1x2048xf32, #tpu.memory_space<vmem>>, vector<1x512xf32>
      %48 = arith.extui %32 : vector<1x512xi1> to vector<1x512xi32>
      %49 = arith.sitofp %48 : vector<1x512xi32> to vector<1x512xf32>
      %50 = arith.addf %47, %49 : vector<1x512xf32>
      %c0_15 = arith.constant 0 : index
      %51 = arith.index_cast %1 : i32 to index
      %52 = vector.load %arg9[%c0_15, %51] : memref<1x2048xf32, #tpu.memory_space<vmem>>, vector<1x512xf32>
      tpu.vector_store %arg9[%c0_15, %51], %50 {strides = array<i32>} : memref<1x2048xf32, #tpu.memory_space<vmem>>, vector<1x512xf32>,
    } else {
    }
    %c3_i32 = arith.constant 3 : i32
    %22 = arith.cmpi eq, %arg0, %c3_i32 : i32
    %c0_i32_8 = arith.constant 0 : i32
    %23 = arith.cmpi eq, %arg1, %c0_i32_8 : i32
    %24 = arith.andi %22, %23 : i1
    %25 = arith.extui %24 : i1 to i32
    %c0_i32_9 = arith.constant 0 : i32
    %26 = arith.cmpi ne, %25, %c0_i32_9 : i32
    scf.if %26 {
      %c0 = arith.constant 0 : index
      %27 = arith.index_cast %1 : i32 to index
      %28 = vector.load %arg9[%c0, %27] : memref<1x2048xf32, #tpu.memory_space<vmem>>, vector<1x512xf32>
      %cst = arith.constant 0.000000e+00 : f32
      %29 = vector.broadcast %cst : f32 to vector<1x512xf32>
      %30 = arith.cmpf ogt, %28, %29 : vector<1x512xf32>
      %c0_10 = arith.constant 0 : index
      %31 = arith.index_cast %1 : i32 to index
      %32 = vector.load %arg8[%c0_10, %31] : memref<2x2048xf32, #tpu.memory_space<vmem>>, vector<2x512xf32>
      %cst_11 = arith.constant 1.000000e+00 : f32
      %33 = vector.broadcast %cst_11 : f32 to vector<1x512xf32>
      %34 = arith.select %30, %28, %33 : vector<1x512xi1>, vector<1x512xf32>
      %35 = vector.broadcast %34 : vector<1x512xf32> to vector<2x512xf32>
      %36 = arith.divf %32, %35 : vector<2x512xf32>
      %cst_12 = arith.constant 0.000000e+00 : f32
      %37 = vector.shape_cast %30 : vector<1x512xi1> to vector<1x512xi1>
      %38 = vector.broadcast %37 : vector<1x512xi1> to vector<2x512xi1>
      %39 = vector.broadcast %cst_12 : f32 to vector<2x512xf32>
      %40 = arith.select %38, %36, %39 : vector<2x512xi1>, vector<2x512xf32>
      %c0_13 = arith.constant 0 : index
      %c0_14 = arith.constant 0 : index
      %41 = vector.load %arg6[%c0_13, %c0_14] : memref<2x512xf32, #tpu.memory_space<vmem>>, vector<2x512xf32>
      tpu.vector_store %arg6[%c0_13, %c0_14], %40 {strides = array<i32>} : memref<2x512xf32, #tpu.memory_space<vmem>>, vector<2x512xf32>,
    } else {
    }
    return
  }
  func.func @transform_0(%arg0: i32, %arg1: i32, %arg2: i32, %arg3: memref<16xi32, #tpu.memory_space<smem>>) -> (i32, i32, i32) {
    %c0_i32 = arith.constant 0 : i32
    %c0_i32_0 = arith.constant 0 : i32
    return %arg0, %c0_i32, %arg1 : i32, i32, i32
  }
  func.func @transform_1(%arg0: i32, %arg1: i32, %arg2: i32, %arg3: memref<16xi32, #tpu.memory_space<smem>>) -> (i32, i32, i32) {
    %c0_i32 = arith.constant 0 : i32
    %c0_i32_0 = arith.constant 0 : i32
    return %arg0, %c0_i32, %arg1 : i32, i32, i32
  }
  func.func @transform_2(%arg0: i32, %arg1: i32, %arg2: i32, %arg3: memref<16xi32, #tpu.memory_space<smem>>) -> (i32, i32) {
    %c0_i32 = arith.constant 0 : i32
    %c0_i32_0 = arith.constant 0 : i32
    return %c0_i32, %arg2 : i32, i32
  }
}

</mosaic_0001>

<bundles_post_ra>
// kernel: tpu_custom_call.1
= control target key start
LH: loop header
LB: loop body
LE: loop exit
PB: predicated region body
PF: predicated region fallthrough
CT: control target
= control target key end

     0   :  { %s2908_s0 = inlined_call_operand.vmem [shape: s32[16], index: 0, kind: input, shape index: {}]   ;;  %s2909_s1 = inlined_call_operand.vmem [shape: f32[4,3,256], index: 1, kind: input, shape index: {}]   ;;  %s2910_s2 = inlined_call_operand.vmem [shape: s32[4,1,256], index: 2, kind: input, shape index: {}]   ;;  %s2911_s3 = inlined_call_operand.hbm [shape: f32[2,2048], index: 3, kind: output, shape index: {}]  }
   0x1   :  { %s8_s14 = sshll.u32 %s2908_s0, 4  ;;  %s9_s14 = int_to_ptr.vmem [resolvable:$true] %s8_s14 }
   0x2   :  { %s1662_s15 = scalar_lea.vmem %s9_s14, 16  ;;  %p1667_p1 = scmp.lt.s32.totalorder %s9_s14, %s9_s14 }
   0x3   :  { %p1663_p0 = scmp.ne.s32.totalorder %s9_s14, %s1662_s15  ;;  %p1668_p2 = scmp.lt.s32.totalorder %s1662_s15, %s1662_s15 }
   0x5   :  { %p1669_p3 = por %p1668_p2, %p1667_p1 }
   0x7   :  { %p1670_p4 = pnand %p1669_p3, %p1663_p0 }
   0x9   :  { %1673 = shalt.err (!%p1670_p4)  }
   0xa   :  { %s1770_s16 = smov [#allocation6]  }
   0xb   :  { %11 = dma.vmem_to_smem %s9_s14, 16, %s1770_s16, [#allocation5] }
   0xc   :  { %1732 = dma.done.wait [#allocation5], 16 }
   0xd   :  { %1733 = vsyncadd [#allocation5], 4294967280 }
   0xe   :  { %13 = sfence }
   0xf   :  { %14 = vsyncpa [#allocation8], 0 }
  0x10   :  { %16 = vsyncpa [#allocation8 + $0x1], 0  ;;  %s1801_s17 = smov 0   ;;  %s1803_s18 = smov 0  }
  0x11   :  { %s1805_s0 = smov 0   ;;  %s1807_s19 = smov 0  }
  0x12   :  { %s1809_s20 = smov 0   ;;  %s1811_s21 = smov 0  }
  0x13   :  { %s1813_s22 = smov 0   ;;  %s1815_s23 = smov 0  }
  0x14 LB: > { %s1290_s24 = sadd.s32 4294967295, %s1768_s23   ;;  %s1291_s25 = sadd.s32 4294967294, %s1768_s23   ;;  %s1768_s23 = sphi %s1815_s23, %s22_s23   ;;  %s1764_s22 = sphi %s1813_s22, %s2975_s22   ;;  %s1760_s21 = sphi %s1811_s21, %s2974_s21   ;;  %s1756_s20 = sphi %s1809_s20, %s2973_s20   ;;  %s1752_s19 = sphi %s1807_s19, %s2972_s19   ;;  %s1748_s0 = sphi %s1805_s0, %s2971_s0   ;;  %s1744_s18 = sphi %s1803_s18, %s2970_s18   ;;  %s1740_s17 = sphi %s1801_s17, %s2969_s17  }
  0x15   : > { %s34_s26 = sadd.s32 1, %s1760_s21  ;;  %s41_s27 = sadd.s32 1, %s1764_s22 }
  0x16   : > { %p35_p5 = scmp.ge.s32.totalorder %s34_s26, 4  ;;  %s104_s28 = sadd.s32 1, %s1748_s0 }
  0x17   : > { %p114_p6 = scmp.ne.s32.totalorder %s1748_s0, %s1744_s18  ;;  %p115_p7 = scmp.eq.s32.totalorder %s1290_s24, 15 }
  0x18   : > { %s2977_s26 = smov (%p35_p5, %s34_s26), 0  ;;  %s2979_s27 = smov (!%p35_p5, %s41_s27), %s1764_s22 }
  0x19   : > { %s101_s29 = ssub.s32 %s1760_s21, %s2977_s26  ;;  %p1853_p8 = por %p115_p7, %p114_p6 }
  0x1a   : > { %p43_p9 = scmp.ge.s32.totalorder %s2979_s27, 4  ;;  %p102_p10 = scmp.eq.s32.totalorder %s101_s29, 0 }
  0x1b   : > { %p120_p11 = scmp.ne.s32.totalorder %s1744_s18, %s1740_s17  ;;  %p121_p12 = scmp.eq.s32.totalorder %s1291_s25, 15 }
  0x1c   : > { %s2981_s27 = smov (%p43_p9, %s2979_s27), 0  ;;  %p1294_p0 = scmp.ge.s32.totalorder %s1768_s23, 1 }
  0x1d   : > { %s1862_s4 = scalar_select %p102_p10, %s1748_s0, %s104_s28  }
  0x1e   : > { %p1864_p13 = por %p121_p12, %p120_p11  ;;  %p164_p1 = scmp.lt.s32.totalorder %s1768_s23, 17 }
  0x20   : > { %p165_p2 = pnand %p1294_p0, %p164_p1 }
  0x21   : > { %s2912_s6 = sand.u32 (!%p165_p2), 1, %s1744_s18   ;;  %p199_p3 = scmp.lt.s32.totalorder (!%p165_p2), %s1756_s20, 3 }
  0x22   : > { %168 = sbr.rel (%p165_p2) target bundleno = 487 (0x1e7), region = 28  ;;  %s1874_s7 = sshll.u32 (!%p165_p2), %s2912_s6, 3 }
  0x23   : > { %s1877_s8 = sshll.u32 (!%p165_p2), %s1752_s19, 9  ;;  %p219_p4 = scmp.eq.s32.totalorder (!%p165_p2), %s1756_s20, 0 }
  0x24   : > { %s197_s25 = scalar_lea.vmem (!%p165_p2), [#allocation7], %s1874_s7 }
  0x27   : > { %s200_s9 = scalar_select %p199_p3, %s1756_s20, 3  ;;  %v231_v0 = vlaneseq (%p219_p4)  ;;  %v1771_v1 = vmov (%p219_p4), 0.0  }
  0x28   : > { %224 = sbr.rel (!%p219_p4) target bundleno = 46 (0x2e), region = 32  ;;  %s225_s28 = sshra.s32 (%p219_p4), %s1877_s8, 7 }
  0x29   : > { %s1573_s10 = sshll.u32 %s200_s9, 3  ;;  %s1298_s11 = sshll.u32 %s200_s9, 1  ;;  %vm233_vm0 = vcmp.lt.s32.totalorder (%p219_p4), %v231_v0, 512 }
  0x2a   : > { %s1884_s14 = scalar_lea.vmem %s2909_s1, %s1573_s10  ;;  %s215_s24 = scalar_lea.vmem %s2910_s2, %s1298_s11 }
  0x2b   : > { %s1301_s29 = sshll.u32 (%p219_p4), %s225_s28, 1  ;;  %s230_s9 = scalar_lea.vmem (%p219_p4), [#allocation4], %s225_s28 }
  0x2c   : > { %s228_s6 = scalar_lea.vmem (%p219_p4), [#allocation3], %s1301_s29  ;;  %235 = vst.msk [vmem:[%s230_s9] sm:$0xf] (%p219_p4), %vm233_vm0, %v1771_v1 }
  0x2d   : > { %229 = vst [vmem:[%s228_s6] sm:$0xff] %v1771_v1 }
  0x2e PF: > { %s1892_s10 = sshra.s32 %s1877_s8, 7  ;;  %s1303_s11 = sshll.u32 %s1756_s20, 2  ;;  %v1772_v2 = vmov 0.0  }
  0x2f   : > { %s1302_s12 = sshll.u32 %s1892_s10, 2  ;;  %s247_s13 = sadd.s32 %s1752_s19, %s1303_s11 }
  0x30   : > { %s248_s15 = sld [smem:[#allocation6 + %s247_s13]]  ;;  %s1897_s16 = scalar_lea.vmem [#allocation2], %s1302_s12 }
  0x31   : > { %243 = vst [vmem:[%s1897_s16] sm:$0x77] %v1772_v2  ;;  %244 = vst [vmem:[%s1897_s16 + $0x8] sm:$0x77] %v1772_v2 }
  0x36   : > { %p1304_p5 = scmp.eq.s32.totalorder %s248_s15, 0 }
  0x38   : > { %252 = sbr.rel (%p1304_p5) target bundleno = 398 (0x18e), region = 40 }
  0x3d   : > { %v255_v3 = vlaneseq  ;;  %v254_v5 = vld [vmem:[%s215_s24] sm:$0x3]  ;;  %v1906_v6 = vstv %s1877_s8  ;;  %v1773_v23 = vmov 1.0  }
  0x3f   : > { %v1903_v4 = vshrl.u32 %v255_v3, 7 }
  0x41   : > { %v271_v7 = vadd.s32 120, %v1903_v4  ;;  %v391_v8 = vsub.s32 1, %v1903_v4  ;;  %v303_v9 = vadd.s32 376, %v1903_v4  ;;  %v387_v10 = vsub.s32 0, %v1903_v4 }
  0x42   : > { %v270_v11 = vadd.s32 112, %v1903_v4  ;;  %v302_v12 = vadd.s32 368, %v1903_v4  ;;  %v269_v13 = vadd.s32 104, %v1903_v4  ;;  %v301_v14 = vadd.s32 360, %v1903_v4 }
  0x43   : > { %v336_v15 = vadd.s32 %v1906_v6, %v271_v7  ;;  %v1917_v16 = vrot.slane %v254_v5, %v391_v8  ;;  %v368_v17 = vadd.s32 %v1906_v6, %v303_v9  ;;  %v1920_v18 = vrot.slane %v254_v5, %v387_v10 }
  0x44   : > { %v335_v19 = vadd.s32 %v1906_v6, %v270_v11  ;;  %v367_v20 = vadd.s32 %v1906_v6, %v302_v12  ;;  %v334_v21 = vadd.s32 %v1906_v6, %v269_v13  ;;  %v366_v22 = vadd.s32 %v1906_v6, %v301_v14 }
  0x45   : > { %vm424_vm1 = vcmp.eq.s32.totalorder %v1917_v16, %v336_v15  ;;  %vm488_vm2 = vcmp.eq.s32.totalorder %v1917_v16, %v368_v17  ;;  %vm423_vm3 = vcmp.eq.s32.totalorder %v1920_v18, %v336_v15  ;;  %vm487_vm4 = vcmp.eq.s32.totalorder %v1920_v18, %v368_v17 }
  0x46   : > { %1434 = vmatprep.subr.msk.mxu0 %vm424_vm1, %v1773_v23  ;;  %1498 = vmatprep.subr.msk.mxu1 %vm488_vm2, %v1773_v23  ;;  %vm422_vm5 = vcmp.eq.s32.totalorder %v1917_v16, %v335_v19  ;;  %vm486_vm6 = vcmp.eq.s32.totalorder %v1917_v16, %v367_v20  ;;  %v268_v24 = vadd.s32 96, %v1903_v4  ;;  %v300_v25 = vadd.s32 352, %v1903_v4 }
  0x47   : > { %1435 = vmatpush1.xpose.msk.msra.mxu0 %vm423_vm3, %v1773_v23  ;;  %1499 = vmatpush1.xpose.msk.msra.mxu1 %vm487_vm4, %v1773_v23  ;;  %vm421_vm7 = vcmp.eq.s32.totalorder %v1920_v18, %v335_v19  ;;  %vm485_vm8 = vcmp.eq.s32.totalorder %v1920_v18, %v367_v20  ;;  %vm420_vm9 = vcmp.eq.s32.totalorder %v1917_v16, %v334_v21  ;;  %v267_v26 = vadd.s32 88, %v1903_v4 }
  0x48   : > { %1436 = vmatprep.subr.msk.mxu0 %vm422_vm5, %v1773_v23  ;;  %1500 = vmatprep.subr.msk.mxu1 %vm486_vm6, %v1773_v23  ;;  %vm484_vm10 = vcmp.eq.s32.totalorder %v1917_v16, %v366_v22  ;;  %v333_v27 = vadd.s32 %v1906_v6, %v268_v24  ;;  %v365_v28 = vadd.s32 %v1906_v6, %v300_v25  ;;  %v299_v29 = vadd.s32 344, %v1903_v4 }
  0x49   : > { %vm419_vm11 = vcmp.eq.s32.totalorder %v1920_v18, %v334_v21  ;;  %vm483_vm12 = vcmp.eq.s32.totalorder %v1920_v18, %v366_v22  ;;  %v332_v30 = vadd.s32 %v1906_v6, %v267_v26  ;;  %v266_v31 = vadd.s32 80, %v1903_v4 }
  0x4a   : > { %vm418_vm13 = vcmp.eq.s32.totalorder %v1917_v16, %v333_v27  ;;  %vm482_vm14 = vcmp.eq.s32.totalorder %v1917_v16, %v365_v28  ;;  %v364_v32 = vadd.s32 %v1906_v6, %v299_v29  ;;  %v298_v33 = vadd.s32 336, %v1903_v4 }
  0x4b   : > { %1437 = vmatpush1.xpose.msk.msra.mxu0 %vm421_vm7, %v1773_v23  ;;  %1501 = vmatpush1.xpose.msk.msra.mxu1 %vm485_vm8, %v1773_v23  ;;  %vm417_vm15 = vcmp.eq.s32.totalorder %v1920_v18, %v333_v27  ;;  %vm481_vm0 = vcmp.eq.s32.totalorder %v1920_v18, %v365_v28  ;;  %vm416_vm1 = vcmp.eq.s32.totalorder %v1917_v16, %v332_v30  ;;  %v265_v34 = vadd.s32 72, %v1903_v4 }
  0x4c   : > { %1438 = vmatprep.subr.msk.mxu0 %vm420_vm9, %v1773_v23  ;;  %1502 = vmatprep.subr.msk.mxu1 %vm484_vm10, %v1773_v23  ;;  %v297_v35 = vadd.s32 328, %v1903_v4  ;;  %vm480_vm2 = vcmp.eq.s32.totalorder %v1917_v16, %v364_v32  ;;  %v331_v36 = vadd.s32 %v1906_v6, %v266_v31  ;;  %v363_v37 = vadd.s32 %v1906_v6, %v298_v33 }
  0x4d   : > { %v264_v38 = vadd.s32 64, %v1903_v4  ;;  %v296_v39 = vadd.s32 320, %v1903_v4  ;;  %v263_v40 = vadd.s32 56, %v1903_v4  ;;  %vm415_vm3 = vcmp.eq.s32.totalorder %v1920_v18, %v332_v30 }
  0x4e   : > { %vm479_vm4 = vcmp.eq.s32.totalorder %v1920_v18, %v364_v32  ;;  %v330_v41 = vadd.s32 %v1906_v6, %v265_v34  ;;  %vm414_vm5 = vcmp.eq.s32.totalorder %v1917_v16, %v331_v36  ;;  %vm478_vm6 = vcmp.eq.s32.totalorder %v1917_v16, %v363_v37 }
  0x4f   : > { %1439 = vmatpush1.xpose.msk.msra.mxu0 %vm419_vm11, %v1773_v23  ;;  %1503 = vmatpush1.xpose.msk.msra.mxu1 %vm483_vm12, %v1773_v23  ;;  %v362_v42 = vadd.s32 %v1906_v6, %v297_v35  ;;  %v1986_v43 = vadd.s32 %v1906_v6, %v264_v38  ;;  %v1989_v44 = vadd.s32 %v1906_v6, %v296_v39  ;;  %v295_v45 = vadd.s32 312, %v1903_v4 }
  0x50   : > { %1440 = vmatprep.subr.msk.mxu0 %vm418_vm13, %v1773_v23  ;;  %1504 = vmatprep.subr.msk.mxu1 %vm482_vm14, %v1773_v23  ;;  %v262_v46 = vadd.s32 48, %v1903_v4  ;;  %vm413_vm7 = vcmp.eq.s32.totalorder %v1920_v18, %v331_v36  ;;  %v1997_v47 = vadd.s32 %v1906_v6, %v263_v40  ;;  %v294_v48 = vadd.s32 304, %v1903_v4 }
  0x51   : > { %vm477_vm8 = vcmp.eq.s32.totalorder %v1920_v18, %v363_v37  ;;  %vm412_vm9 = vcmp.eq.s32.totalorder %v1917_v16, %v330_v41  ;;  %v261_v49 = vadd.s32 40, %v1903_v4  ;;  %v293_v50 = vadd.s32 296, %v1903_v4 }
  0x52   : > { %vm476_vm10 = vcmp.eq.s32.totalorder %v1917_v16, %v362_v42  ;;  %vm411_vm11 = vcmp.eq.s32.totalorder %v1920_v18, %v330_v41  ;;  %vm475_vm12 = vcmp.eq.s32.totalorder %v1920_v18, %v362_v42  ;;  %vm410_vm13 = vcmp.eq.s32.totalorder %v1917_v16, %v1986_v43 }
  0x53   : > { %1441 = vmatpush1.xpose.msk.msra.mxu0 %vm417_vm15, %v1773_v23  ;;  %1505 = vmatpush1.xpose.msk.msra.mxu1 %vm481_vm0, %v1773_v23  ;;  %vm474_vm14 = vcmp.eq.s32.totalorder %v1917_v16, %v1989_v44  ;;  %vm409_vm15 = vcmp.eq.s32.totalorder %v1920_v18, %v1986_v43  ;;  %v2016_v51 = vadd.s32 %v1906_v6, %v295_v45  ;;  %v260_v54 = vadd.s32 32, %v1903_v4 }
  0x54   : > { %1442 = vmatprep.subr.msk.mxu0 %vm416_vm1, %v1773_v23  ;;  %1506 = vmatprep.subr.msk.mxu1 %vm480_vm2, %v1773_v23  ;;  %v2019_v52 = vadd.s32 %v1906_v6, %v262_v46  ;;  %vm473_vm0 = vcmp.eq.s32.totalorder %v1920_v18, %v1989_v44  ;;  %vm408_vm1 = vcmp.eq.s32.totalorder %v1917_v16, %v1997_v47  ;;  %v292_v57 = vadd.s32 288, %v1903_v4 }
  0x55   : > { %v2030_v53 = vadd.s32 %v1906_v6, %v294_v48  ;;  %vm407_vm2 = vcmp.eq.s32.totalorder %v1920_v18, %v1997_v47  ;;  %v2040_v55 = vadd.s32 %v1906_v6, %v261_v49  ;;  %v2043_v56 = vadd.s32 %v1906_v6, %v293_v50 }
  0x56   : > { %v259_v58 = vadd.s32 24, %v1903_v4  ;;  %v291_v59 = vadd.s32 280, %v1903_v4  ;;  %v258_v60 = vadd.s32 16, %v1903_v4  ;;  %v290_v61 = vadd.s32 272, %v1903_v4 }
  0x57   : > { %1443 = vmatpush1.xpose.msk.msra.mxu0 %vm415_vm3, %v1773_v23  ;;  %1507 = vmatpush1.xpose.msk.msra.mxu1 %vm479_vm4, %v1773_v23  ;;  %vm472_vm3 = vcmp.eq.s32.totalorder %v1917_v16, %v2016_v51  ;;  %vm471_vm4 = vcmp.eq.s32.totalorder %v1920_v18, %v2016_v51  ;;  %v2065_v62 = vadd.s32 %v1906_v6, %v260_v54  ;;  %v257_v63 = vadd.s32 8, %v1903_v4 }
  0x58   : > { %1444 = vmatprep.subr.msk.mxu0 %vm414_vm5, %v1773_v23  ;;  %1508 = vmatprep.subr.msk.mxu1 %vm478_vm6, %v1773_v23  ;;  %vm406_vm5 = vcmp.eq.s32.totalorder %v1917_v16, %v2019_v52  ;;  %vm470_vm6 = vcmp.eq.s32.totalorder %v1917_v16, %v2030_v53  ;;  %v289_v0 = vadd.s32 264, %v1903_v4  ;;  %v288_v1 = vadd.s32 256, %v1903_v4 }
  0x59   : > { %v287_v3 = vadd.s32 248, %v1903_v4  ;;  %v319_v5 = vadd.s32 504, %v1903_v4  ;;  %v2089_v7 = vadd.s32 %v1906_v6, %v292_v57  ;;  %v2092_v8 = vadd.s32 %v1906_v6, %v259_v58 }
  0x5a   : > { %v2095_v9 = vadd.s32 %v1906_v6, %v291_v59  ;;  %v2098_v10 = vadd.s32 %v1906_v6, %v258_v60  ;;  %v2101_v11 = vadd.s32 %v1906_v6, %v290_v61  ;;  %v286_v12 = vadd.s32 240, %v1903_v4 }
  0x5b   : > { %1445 = vmatpush1.xpose.msk.msra.mxu0 %vm413_vm7, %v1773_v23  ;;  %1509 = vmatpush1.xpose.msk.msra.mxu1 %vm477_vm8, %v1773_v23  ;;  %vm405_vm7 = vcmp.eq.s32.totalorder %v1920_v18, %v2019_v52  ;;  %vm469_vm8 = vcmp.eq.s32.totalorder %v1920_v18, %v2030_v53  ;;  %v318_v13 = vadd.s32 496, %v1903_v4  ;;  %v285_v14 = vadd.s32 232, %v1903_v4 }
  0x5c   : > { %1446 = vmatprep.subr.msk.mxu0 %vm412_vm9, %v1773_v23  ;;  %1510 = vmatprep.subr.msk.mxu1 %vm476_vm10, %v1773_v23  ;;  %vm404_vm9 = vcmp.eq.s32.totalorder %v1917_v16, %v2040_v55  ;;  %vm468_vm10 = vcmp.eq.s32.totalorder %v1917_v16, %v2043_v56  ;;  %v2115_v15 = vadd.s32 %v1906_v6, %v257_v63  ;;  %v317_v20 = vadd.s32 488, %v1903_v4 }
  0x5d   : > { %v2118_v17 = vadd.s32 %v1906_v6, %v289_v0  ;;  %v2122_v19 = vadd.s32 %v1906_v6, %v1903_v4  ;;  %v2138_v21 = vadd.s32 %v1906_v6, %v288_v1  ;;  %v2141_v22 = vadd.s32 %v1906_v6, %v287_v3 }
  0x5e   : > { %v2144_v24 = vadd.s32 %v1906_v6, %v319_v5  ;;  %v284_v25 = vadd.s32 224, %v1903_v4  ;;  %v2152_v26 = vadd.s32 %v1906_v6, %v286_v12  ;;  %v2155_v27 = vadd.s32 %v1906_v6, %v318_v13 }
  0x5f   : > { %1447 = vmatpush1.xpose.msk.msra.mxu0 %vm411_vm11, %v1773_v23  ;;  %1511 = vmatpush1.xpose.msk.msra.mxu1 %vm475_vm12, %v1773_v23  ;;  %vm403_vm11 = vcmp.eq.s32.totalorder %v1920_v18, %v2040_v55  ;;  %vm467_vm12 = vcmp.eq.s32.totalorder %v1920_v18, %v2043_v56  ;;  %v2158_v28 = vadd.s32 %v1906_v6, %v285_v14  ;;  %v316_v31 = vadd.s32 480, %v1903_v4 }
  0x60   : > { %1448 = vmatprep.subr.msk.mxu0 %vm410_vm13, %v1773_v23  ;;  %1512 = vmatprep.subr.msk.mxu1 %vm474_vm14, %v1773_v23  ;;  %vm402_vm13 = vcmp.eq.s32.totalorder %v1917_v16, %v2065_v62  ;;  %vm466_vm14 = vcmp.eq.s32.totalorder %v1917_v16, %v2089_v7  ;;  %v2161_v29 = vadd.s32 %v1906_v6, %v317_v20  ;;  %v283_v32 = vadd.s32 216, %v1903_v4 }
  0x61   : > { %v2164_v30 = vadd.s32 %v1906_v6, %v284_v25  ;;  %v315_v33 = vadd.s32 472, %v1903_v4  ;;  %v282_v34 = vadd.s32 208, %v1903_v4  ;;  %v314_v35 = vadd.s32 464, %v1903_v4 }
  0x62   : > { %v2214_v36 = vadd.s32 %v1906_v6, %v316_v31  ;;  %v2219_v37 = vadd.s32 %v1906_v6, %v283_v32  ;;  %v281_v41 = vadd.s32 200, %v1903_v4  ;;  %v313_v42 = vadd.s32 456, %v1903_v4 }
  0x63   : > { %1449 = vmatpush1.xpose.msk.msra.mxu0 %vm409_vm15, %v1773_v23  ;;  %1513 = vmatpush1.xpose.msk.msra.mxu1 %vm473_vm0, %v1773_v23  ;;  %vm464_vm0 = vcmp.eq.s32.totalorder %v1917_v16, %v2095_v9  ;;  %v2222_v38 = vadd.s32 %v1906_v6, %v315_v33  ;;  %v2225_v39 = vadd.s32 %v1906_v6, %v282_v34  ;;  %v280_v45 = vadd.s32 192, %v1903_v4 }
  0x64   : > { %1450 = vmatprep.subr.msk.mxu0 %vm408_vm1, %v1773_v23  ;;  %1514 = vmatprep.subr.msk.mxu1 %vm472_vm3, %v1773_v23  ;;  %vm465_vm3 = vcmp.eq.s32.totalorder %v1920_v18, %v2089_v7  ;;  %v2240_v40 = vadd.s32 %v1906_v6, %v314_v35  ;;  %v2277_v43 = vadd.s32 %v1906_v6, %v281_v41  ;;  %v312_v46 = vadd.s32 448, %v1903_v4 }
  0x65   : > { %v2280_v44 = vadd.s32 %v1906_v6, %v313_v42  ;;  %v279_v47 = vadd.s32 184, %v1903_v4  ;;  %v311_v48 = vadd.s32 440, %v1903_v4  ;;  %v278_v49 = vadd.s32 176, %v1903_v4 }
  0x66   : > { %v310_v50 = vadd.s32 432, %v1903_v4  ;;  %v2321_v51 = vadd.s32 %v1906_v6, %v280_v45  ;;  %v2324_v52 = vadd.s32 %v1906_v6, %v312_v46  ;;  %v277_v57 = vadd.s32 168, %v1903_v4 }
  0x67   : > { %1451 = vmatpush1.xpose.msk.msra.mxu0 %vm407_vm2, %v1773_v23  ;;  %1515 = vmatpush1.xpose.msk.msra.mxu1 %vm471_vm4, %v1773_v23  ;;  %vm401_vm2 = vcmp.eq.s32.totalorder %v1920_v18, %v2065_v62  ;;  %vm462_vm4 = vcmp.eq.s32.totalorder %v1917_v16, %v2101_v11  ;;  %v2327_v53 = vadd.s32 %v1906_v6, %v279_v47  ;;  %v309_v58 = vadd.s32 424, %v1903_v4 }
  0x68   : > { %1452 = vmatprep.subr.msk.mxu0 %vm406_vm5, %v1773_v23  ;;  %1516 = vmatprep.subr.msk.mxu1 %vm470_vm6, %v1773_v23  ;;  %vm400_vm6 = vcmp.eq.s32.totalorder %v1917_v16, %v2092_v8  ;;  %vm460_vm5 = vcmp.eq.s32.totalorder %v1917_v16, %v2118_v17  ;;  %v2330_v54 = vadd.s32 %v1906_v6, %v311_v48  ;;  %v276_v59 = vadd.s32 160, %v1903_v4 }
  0x69   : > { %v2333_v55 = vadd.s32 %v1906_v6, %v278_v49  ;;  %v2336_v56 = vadd.s32 %v1906_v6, %v310_v50  ;;  %vm458_vm1 = vcmp.eq.s32.totalorder %v1917_v16, %v2138_v21  ;;  %v2390_v60 = vadd.s32 %v1906_v6, %v277_v57 }
  0x6a   : > { %v2393_v61 = vadd.s32 %v1906_v6, %v309_v58  ;;  %v2404_v62 = vadd.s32 %v1906_v6, %v276_v59  ;;  %v308_v63 = vadd.s32 416, %v1903_v4  ;;  %v275_v0 = vadd.s32 152, %v1903_v4 }
  0x6b   : > { %1453 = vmatpush1.xpose.msk.msra.mxu0 %vm405_vm7, %v1773_v23  ;;  %1517 = vmatpush1.xpose.msk.msra.mxu1 %vm469_vm8, %v1773_v23  ;;  %vm399_vm7 = vcmp.eq.s32.totalorder %v1920_v18, %v2092_v8  ;;  %vm439_vm8 = vcmp.eq.s32.totalorder %v1920_v18, %v2327_v53  ;;  %v307_v1 = vadd.s32 408, %v1903_v4  ;;  %v274_v3 = vadd.s32 144, %v1903_v4 }
  0x6c   : > { %1454 = vmatprep.subr.msk.mxu0 %vm404_vm9, %v1773_v23  ;;  %1518 = vmatprep.subr.msk.mxu1 %vm468_vm10, %v1773_v23  ;;  %vm398_vm10 = vcmp.eq.s32.totalorder %v1917_v16, %v2098_v10  ;;  %vm500_vm15 = vcmp.eq.s32.totalorder %v1917_v16, %v2393_v61  ;;  %vm499_vm9 = vcmp.eq.s32.totalorder %v1920_v18, %v2393_v61  ;;  %v306_v12 = vadd.s32 400, %v1903_v4 }
  0x6d   : > { %v2437_v5 = vadd.s32 %v1906_v6, %v308_v63  ;;  %v2442_v7 = vadd.s32 %v1906_v6, %v275_v0  ;;  %v2445_v8 = vadd.s32 %v1906_v6, %v307_v1  ;;  %v273_v13 = vadd.s32 136, %v1903_v4 }
  0x6e   : > { %v305_v14 = vadd.s32 392, %v1903_v4  ;;  %v2488_v20 = vadd.s32 %v1906_v6, %v306_v12  ;;  %v304_v33 = vadd.s32 384, %v1903_v4 }
  0x6f   : > { %1455 = vmatpush1.xpose.msk.msra.mxu0 %vm403_vm11, %v1773_v23  ;;  %1519 = vmatpush1.xpose.msk.msra.mxu1 %vm467_vm12, %v1773_v23  ;;  %vm397_vm11 = vcmp.eq.s32.totalorder %v1920_v18, %v2098_v10  ;;  %vm461_vm12 = vcmp.eq.s32.totalorder %v1920_v18, %v2101_v11  ;;  %v272_v10 = vadd.s32 128, %v1903_v4  ;;  %v2481_v11 = vld [vmem:[%s1884_s14] sm:$0x77]  ;;  %v2493_v25 = vadd.s32 %v1906_v6, %v273_v13 }
  0x70   : > { %1456 = vmatprep.subr.msk.mxu0 %vm402_vm13, %v1773_v23  ;;  %1520 = vmatprep.subr.msk.mxu1 %vm466_vm14, %v1773_v23  ;;  %vm396_vm14 = vcmp.eq.s32.totalorder %v1917_v16, %v2115_v15  ;;  %vm520_vm13 = vcmp.eq.s32.totalorder %v1917_v16, %v2144_v24  ;;  %v2496_v31 = vadd.s32 %v1906_v6, %v305_v14 }
  0x71   : > { %v2499_v32 = vadd.s32 %v1906_v6, %v272_v10  ;;  %v784_v34 = vcombine.high %v2481_v11, %v2481_v11  ;;  %v2535_v4 = vadd.s32 %v1906_v6, %v304_v33 }
  0x73   : > { %1457 = vmatpush1.xpose.msk.msra.mxu0 %vm401_vm2, %v1773_v23  ;;  %1521 = vmatpush1.xpose.msk.msra.mxu1 %vm465_vm3, %v1773_v23  ;;  %vm395_vm2 = vcmp.eq.s32.totalorder %v1920_v18, %v2115_v15  ;;  %vm459_vm3 = vcmp.eq.s32.totalorder %v1920_v18, %v2118_v17 }
  0x74   : > { %1458 = vmatprep.subr.msk.mxu0 %vm400_vm6, %v1773_v23  ;;  %1522 = vmatprep.subr.msk.mxu1 %vm464_vm0, %v1773_v23  ;;  %vm2915_vm6 = vcmp.eq.s32.totalorder %v1920_v18, %v2095_v9  ;;  %v2448_v9 = vadd.s32 %v1906_v6, %v274_v3  ;;  %vm431_vm0 = vcmp.eq.s32.totalorder %v1920_v18, %v2442_v7 }
  0x75   : > { %850 = vmatprep.mubr.f32.mxu0 %v784_v34  ;;  %921 = vmatprep.mubr.f32.mxu1 %v784_v34 }
  0x77   : > { %1459 = vmatpush1.xpose.msk.msra.mxu0 %vm399_vm7, %v1773_v23  ;;  %1523 = vmatpush1.xpose.msk.msra.mxu1 %vm2915_vm6, %v1773_v23  ;;  %vm393_vm7 = vcmp.eq.s32.totalorder %v1920_v18, %v2122_v19  ;;  %vm457_vm6 = vcmp.eq.s32.totalorder %v1920_v18, %v2138_v21 }
  0x78   : > { %1460 = vmatprep.subr.msk.mxu0 %vm398_vm10, %v1773_v23  ;;  %1524 = vmatprep.subr.msk.mxu1 %vm462_vm4, %v1773_v23  ;;  %vm456_vm4 = vcmp.eq.s32.totalorder %v1917_v16, %v2141_v22  ;;  %vm427_vm10 = vcmp.eq.s32.totalorder %v1920_v18, %v2493_v25 }
  0x7b   : > { %1461 = vmatpush1.xpose.msk.msra.mxu0 %vm397_vm11, %v1773_v23  ;;  %1525 = vmatpush1.xpose.msk.msra.mxu1 %vm461_vm12, %v1773_v23  ;;  %vm432_vm11 = vcmp.eq.s32.totalorder %v1917_v16, %v2442_v7  ;;  %vm496_vm12 = vcmp.eq.s32.totalorder %v1917_v16, %v2445_v8 }
  0x7c   : > { %1462 = vmatprep.subr.msk.mxu0 %vm396_vm14, %v1773_v23  ;;  %1526 = vmatprep.subr.msk.mxu1 %vm460_vm5, %v1773_v23  ;;  %vm2916_vm14 = vcmp.eq.s32.totalorder %v1917_v16, %v2122_v19  ;;  %vm2917_vm5 = vcmp.eq.s32.totalorder %v1917_v16, %v2152_v26  ;;  %v782_v19 = vld [vmem:[%s1897_s16 + $0x8] sm:$0x77] }
  0x7f   : > { %1463 = vmatpush1.xpose.msk.msra.mxu0 %vm395_vm2, %v1773_v23  ;;  %1527 = vmatpush1.xpose.msk.msra.mxu1 %vm459_vm3, %v1773_v23  ;;  %vm428_vm2 = vcmp.eq.s32.totalorder %v1917_v16, %v2493_v25  ;;  %vm492_vm3 = vcmp.eq.s32.totalorder %v1917_v16, %v2496_v31 }
  0x80   : > { %1464 = vmatprep.subr.msk.mxu0 %vm2916_vm14, %v1773_v23  ;;  %1528 = vmatprep.subr.msk.mxu1 %vm458_vm1, %v1773_v23  ;;  %vm425_vm1 = vcmp.eq.s32.totalorder %v1920_v18, %v2499_v32  ;;  %vm490_vm14 = vcmp.eq.s32.totalorder %v1917_v16, %v2535_v4 }
  0x83   : > { %1465 = vmatpush1.xpose.msk.msra.mxu0 %vm393_vm7, %v1773_v23  ;;  %1529 = vmatpush1.xpose.msk.msra.mxu1 %vm457_vm6, %v1773_v23  ;;  %vm455_vm7 = vcmp.eq.s32.totalorder %v1920_v18, %v2141_v22  ;;  %vm519_vm6 = vcmp.eq.s32.totalorder %v1920_v18, %v2144_v24 }
  0x84   : > { %1466 = vmatprep.subr.msk.mxu0 %vm456_vm4, %v1773_v23  ;;  %1530 = vmatprep.subr.msk.mxu1 %vm520_vm13, %v1773_v23  ;;  %vm2918_vm4 = vcmp.eq.s32.totalorder %v1917_v16, %v2155_v27  ;;  %vm2919_vm13 = vcmp.eq.s32.totalorder %v1920_v18, %v2152_v26 }
  0x87   : > { %1467 = vmatpush2.xpose.msk.msra.mxu0 %vm455_vm7, %v1773_v23  ;;  %1531 = vmatpush2.xpose.msk.msra.mxu1 %vm519_vm6, %v1773_v23  ;;  %vm2920_vm7 = vcmp.eq.s32.totalorder %v1920_v18, %v2155_v27  ;;  %vm2921_vm6 = vcmp.eq.s32.totalorder %v1917_v16, %v2158_v28 }
  0x88   : > { %1468 = vmatprep.subr.msk.mxu0 %vm2917_vm5, %v1773_v23  ;;  %1532 = vmatprep.subr.msk.mxu1 %vm2918_vm4, %v1773_v23  ;;  %vm2922_vm5 = vcmp.eq.s32.totalorder %v1917_v16, %v2161_v29  ;;  %vm2923_vm4 = vcmp.eq.s32.totalorder %v1920_v18, %v2158_v28 }
  0x8b   : > { %1469 = vmatpush2.xpose.msk.msra.mxu0 %vm2919_vm13, %v1773_v23  ;;  %1533 = vmatpush2.xpose.msk.msra.mxu1 %vm2920_vm7, %v1773_v23  ;;  %vm2924_vm13 = vcmp.eq.s32.totalorder %v1920_v18, %v2161_v29  ;;  %vm2925_vm7 = vcmp.eq.s32.totalorder %v1917_v16, %v2164_v30 }
  0x8c   : > { %1470 = vmatprep.subr.msk.mxu0 %vm2921_vm6, %v1773_v23  ;;  %1534 = vmatprep.subr.msk.mxu1 %vm2922_vm5, %v1773_v23  ;;  %vm2926_vm6 = vcmp.eq.s32.totalorder %v1917_v16, %v2214_v36  ;;  %vm2927_vm5 = vcmp.eq.s32.totalorder %v1920_v18, %v2164_v30 }
  0x8f   : > { %1471 = vmatpush2.xpose.msk.msra.mxu0 %vm2923_vm4, %v1773_v23  ;;  %1535 = vmatpush2.xpose.msk.msra.mxu1 %vm2924_vm13, %v1773_v23  ;;  %vm2928_vm4 = vcmp.eq.s32.totalorder %v1920_v18, %v2214_v36  ;;  %vm2929_vm13 = vcmp.eq.s32.totalorder %v1917_v16, %v2219_v37 }
  0x90   : > { %1472 = vmatprep.subr.msk.mxu0 %vm2925_vm7, %v1773_v23  ;;  %1536 = vmatprep.subr.msk.mxu1 %vm2926_vm6, %v1773_v23  ;;  %vm2930_vm7 = vcmp.eq.s32.totalorder %v1917_v16, %v2222_v38  ;;  %vm2931_vm6 = vcmp.eq.s32.totalorder %v1920_v18, %v2219_v37 }
  0x93   : > { %1473 = vmatpush2.xpose.msk.msra.mxu0 %vm2927_vm5, %v1773_v23  ;;  %1537 = vmatpush2.xpose.msk.msra.mxu1 %vm2928_vm4, %v1773_v23  ;;  %vm2932_vm5 = vcmp.eq.s32.totalorder %v1920_v18, %v2222_v38  ;;  %vm2933_vm4 = vcmp.eq.s32.totalorder %v1917_v16, %v2225_v39 }
  0x94   : > { %1474 = vmatprep.subr.msk.mxu0 %vm2929_vm13, %v1773_v23  ;;  %1538 = vmatprep.subr.msk.mxu1 %vm2930_vm7, %v1773_v23  ;;  %vm2934_vm13 = vcmp.eq.s32.totalorder %v1917_v16, %v2240_v40  ;;  %vm2935_vm7 = vcmp.eq.s32.totalorder %v1920_v18, %v2225_v39 }
  0x97   : > { %1475 = vmatpush2.xpose.msk.msra.mxu0 %vm2931_vm6, %v1773_v23  ;;  %1539 = vmatpush2.xpose.msk.msra.mxu1 %vm2932_vm5, %v1773_v23  ;;  %vm2936_vm6 = vcmp.eq.s32.totalorder %v1920_v18, %v2240_v40  ;;  %vm2937_vm5 = vcmp.eq.s32.totalorder %v1917_v16, %v2277_v43 }
  0x98   : > { %1476 = vmatprep.subr.msk.mxu0 %vm2933_vm4, %v1773_v23  ;;  %1540 = vmatprep.subr.msk.mxu1 %vm2934_vm13, %v1773_v23  ;;  %vm2938_vm4 = vcmp.eq.s32.totalorder %v1917_v16, %v2280_v44  ;;  %vm2939_vm13 = vcmp.eq.s32.totalorder %v1920_v18, %v2277_v43 }
  0x9b   : > { %1477 = vmatpush2.xpose.msk.msra.mxu0 %vm2935_vm7, %v1773_v23  ;;  %1541 = vmatpush2.xpose.msk.msra.mxu1 %vm2936_vm6, %v1773_v23  ;;  %vm2940_vm7 = vcmp.eq.s32.totalorder %v1920_v18, %v2280_v44  ;;  %vm2941_vm6 = vcmp.eq.s32.totalorder %v1917_v16, %v2321_v51 }
  0x9c   : > { %1478 = vmatprep.subr.msk.mxu0 %vm2937_vm5, %v1773_v23  ;;  %1542 = vmatprep.subr.msk.mxu1 %vm2938_vm4, %v1773_v23  ;;  %vm2942_vm5 = vcmp.eq.s32.totalorder %v1917_v16, %v2324_v52  ;;  %vm2943_vm4 = vcmp.eq.s32.totalorder %v1920_v18, %v2321_v51 }
  0x9f   : > { %1479 = vmatpush2.xpose.msk.msra.mxu0 %vm2939_vm13, %v1773_v23  ;;  %1543 = vmatpush2.xpose.msk.msra.mxu1 %vm2940_vm7, %v1773_v23  ;;  %vm2944_vm13 = vcmp.eq.s32.totalorder %v1920_v18, %v2324_v52  ;;  %vm2945_vm7 = vcmp.eq.s32.totalorder %v1917_v16, %v2327_v53 }
  0xa0   : > { %1480 = vmatprep.subr.msk.mxu0 %vm2941_vm6, %v1773_v23  ;;  %1544 = vmatprep.subr.msk.mxu1 %vm2942_vm5, %v1773_v23  ;;  %vm2946_vm6 = vcmp.eq.s32.totalorder %v1917_v16, %v2330_v54  ;;  %vm2947_vm5 = vcmp.eq.s32.totalorder %v1920_v18, %v2330_v54 }
  0xa3   : > { %1481 = vmatpush2.xpose.msk.msra.mxu0 %vm2943_vm4, %v1773_v23  ;;  %1545 = vmatpush2.xpose.msk.msra.mxu1 %vm2944_vm13, %v1773_v23  ;;  %vm2948_vm4 = vcmp.eq.s32.totalorder %v1917_v16, %v2333_v55  ;;  %vm2949_vm13 = vcmp.eq.s32.totalorder %v1917_v16, %v2336_v56 }
  0xa4   : > { %1482 = vmatprep.subr.msk.mxu0 %vm2945_vm7, %v1773_v23  ;;  %1546 = vmatprep.subr.msk.mxu1 %vm2946_vm6, %v1773_v23  ;;  %vm2950_vm7 = vcmp.eq.s32.totalorder %v1920_v18, %v2333_v55  ;;  %vm2952_vm6 = vcmp.eq.s32.totalorder %v1917_v16, %v2390_v60 }
  0xa7   : > { %1483 = vmatpush2.xpose.msk.msra.mxu0 %vm439_vm8, %v1773_v23  ;;  %1547 = vmatpush2.xpose.msk.msra.mxu1 %vm2947_vm5, %v1773_v23  ;;  %vm2951_vm8 = vcmp.eq.s32.totalorder %v1920_v18, %v2336_v56  ;;  %vm2953_vm5 = vcmp.eq.s32.totalorder %v1920_v18, %v2390_v60 }
  0xa8   : > { %1484 = vmatprep.subr.msk.mxu0 %vm2948_vm4, %v1773_v23  ;;  %1548 = vmatprep.subr.msk.mxu1 %vm2949_vm13, %v1773_v23  ;;  %vm2954_vm4 = vcmp.eq.s32.totalorder %v1917_v16, %v2404_v62  ;;  %vm2955_vm13 = vcmp.eq.s32.totalorder %v1917_v16, %v2437_v5 }
  0xab   : > { %1485 = vmatpush2.xpose.msk.msra.mxu0 %vm2950_vm7, %v1773_v23  ;;  %1549 = vmatpush2.xpose.msk.msra.mxu1 %vm2951_vm8, %v1773_v23  ;;  %vm2957_vm7 = vcmp.eq.s32.totalorder %v1920_v18, %v2437_v5  ;;  %vm2959_vm8 = vcmp.eq.s32.totalorder %v1917_v16, %v2448_v9 }
  0xac   : > { %1486 = vmatprep.subr.msk.mxu0 %vm2952_vm6, %v1773_v23  ;;  %1550 = vmatprep.subr.msk.mxu1 %vm500_vm15, %v1773_v23  ;;  %vm2956_vm15 = vcmp.eq.s32.totalorder %v1920_v18, %v2404_v62  ;;  %vm2963_vm6 = vcmp.eq.s32.totalorder %v1920_v18, %v2496_v31 }
  0xaf   : > { %1487 = vmatpush2.xpose.msk.msra.mxu0 %vm2953_vm5, %v1773_v23  ;;  %1551 = vmatpush2.xpose.msk.msra.mxu1 %vm499_vm9, %v1773_v23  ;;  %vm2958_vm9 = vcmp.eq.s32.totalorder %v1920_v18, %v2445_v8  ;;  %vm2964_vm5 = vcmp.eq.s32.totalorder %v1917_v16, %v2499_v32 }
  0xb0   : > { %1488 = vmatprep.subr.msk.mxu0 %vm2954_vm4, %v1773_v23  ;;  %1552 = vmatprep.subr.msk.mxu1 %vm2955_vm13, %v1773_v23 }
  0xb3   : > { %1489 = vmatpush2.xpose.msk.msra.mxu0 %vm2956_vm15, %v1773_v23  ;;  %1553 = vmatpush2.xpose.msk.msra.mxu1 %vm2957_vm7, %v1773_v23 }
  0xb4   : > { %1490 = vmatprep.subr.msk.mxu0 %vm432_vm11, %v1773_v23  ;;  %1554 = vmatprep.subr.msk.mxu1 %vm496_vm12, %v1773_v23  ;;  %vm2960_vm11 = vcmp.eq.s32.totalorder %v1917_v16, %v2488_v20  ;;  %vm2962_vm12 = vcmp.eq.s32.totalorder %v1920_v18, %v2488_v20  ;;  %v781_v16 = vld [vmem:[%s1897_s16] sm:$0x77] }
  0xb7   : > { %1491 = vmatpush2.xpose.msk.msra.mxu0 %vm431_vm0, %v1773_v23  ;;  %1555 = vmatpush2.xpose.msk.msra.mxu1 %vm2958_vm9, %v1773_v23  ;;  %vm2961_vm0 = vcmp.eq.s32.totalorder %v1920_v18, %v2448_v9 }
  0xb8   : > { %1492 = vmatprep.subr.msk.mxu0 %vm2959_vm8, %v1773_v23  ;;  %1556 = vmatprep.subr.msk.mxu1 %vm2960_vm11, %v1773_v23 }
  0xbb   : > { %1493 = vmatpush2.xpose.msk.msra.mxu0 %vm2961_vm0, %v1773_v23  ;;  %1557 = vmatpush2.xpose.msk.msra.mxu1 %vm2962_vm12, %v1773_v23 }
  0xbc   : > { %1494 = vmatprep.subr.msk.mxu0 %vm428_vm2, %v1773_v23  ;;  %1558 = vmatprep.subr.msk.mxu1 %vm492_vm3, %v1773_v23 }
  0xbf   : > { %1495 = vmatpush2.xpose.msk.msra.mxu0 %vm427_vm10, %v1773_v23  ;;  %1559 = vmatpush2.xpose.msk.msra.mxu1 %vm2963_vm6, %v1773_v23  ;;  %vm2965_vm10 = vcmp.eq.s32.totalorder %v1920_v18, %v2535_v4 }
  0xc0   : > { %1496 = vmatprep.subr.msk.mxu0 %vm2964_vm5, %v1773_v23  ;;  %1560 = vmatprep.subr.msk.mxu1 %vm490_vm14, %v1773_v23 }
  0xc3   : > { %1497 = vmatpush2.xpose.msk.msra.mxu0 %vm425_vm1, %v1773_v23  ;;  %1561 = vmatpush2.xpose.msk.msra.mxu1 %vm2965_vm10, %v1773_v23 }
  0xc6   : > { %851 = vmatmul.mubr.f32.vlgmr.msra.gmra.mxu0 %v2481_v11  ;;  %922 = vmatmul.mubr.f32.vlgmr.msra.gmra.mxu1 %v2481_v11 }
 0x186   : > { %v852_v6 = vpop.f32.mrf.mxu0  ;;  %v923_v15 = vpop.f32.mrf.mxu1 }
 0x188   : > { %v854_v17 = vpop.f32.mrf.mxu0  ;;  %v925_v21 = vpop.f32.mrf.mxu1 }
 0x189   : > { %v932_v22 = vcombine.low %v852_v6, %v854_v17  ;;  %v933_v24 = vcombine.low %v923_v15, %v925_v21 }
 0x18b   : > { %v936_v26 = vadd.f32 %v932_v22, %v781_v16  ;;  %v937_v27 = vadd.f32 %v933_v24, %v782_v19 }
 0x18d   : > { %938 = vst [vmem:[%s1897_s16] sm:$0x77] %v936_v26  ;;  %939 = vst [vmem:[%s1897_s16 + $0x8] sm:$0x77] %v937_v27 }
 0x18e PF: > { %v954_v28 = vlaneseq  ;;  %p1045_p6 = scmp.eq.s32.totalorder %s1756_s20, 3  ;;  %s2815_s6 = scalar_lea.vmem [#allocation4], %s1892_s10  ;;  %v1774_v46 = vmov 0   ;;  %v1775_v49 = vmov 1983009808  }
 0x18f   : > { %v1037_v30 = vld [vmem:[%s2815_s6] sm:$0xf]  ;;  %v1019_v50 = vunpack.c.l.s4 %v1775_v49  ;;  %s1564_s8 = sshll.u32 %s1892_s10, 1  ;;  %v1776_v19 = vmov (%p1045_p6), 0  }
 0x190   : > { %v955_v23 = vshrl.u32 %v954_v28, 7  ;;  %vm1042_vm3 = vcmp.lt.s32.totalorder %v954_v28, 512  ;;  %s1010_s14 = scalar_lea.vmem [#allocation3], %s1564_s8 }
 0x191   : > { %v1020_v58 = vunpack.c.0.s8 %v1019_v50  ;;  %v1011_v14 = vld [vmem:[%s1010_s14] sm:$0xff] }
 0x192   : > { %v2820_v36 = vsub.s32 0, %v955_v23  ;;  %v2822_v37 = vsub.s32 1, %v955_v23  ;;  %v2824_v38 = vsub.s32 2, %v955_v23  ;;  %v2826_v39 = vsub.s32 3, %v955_v23 }
 0x193   : > { %v1023_v3 = vsub.s32 %v1020_v58, %v955_v23 }
 0x194   : > { %v1563_v18 = vld [vmem:[%s1897_s16 + $0x2] ss:$4 sm:$0xf]  ;;  %v947_v52 = vld [vmem:[%s1897_s16] sm:$0x33] }
 0x195   : > { %vm951_vm2 = vcmp.gt.f32.partialorder %v1563_v18, 0.0  ;;  %v948_v54 = vld [vmem:[%s1897_s16 + $0x8] sm:$0x33] }
 0x196   : > { %v952_v29 = vsel %vm951_vm2, %v1563_v18, 1.0  ;;  %v1565_v35 = vsel %vm951_vm2, 1.0, %v1772_v2  ;;  %v978_v47 = vsel %vm951_vm2, 1, %v1774_v46 }
 0x197   : > { %v1039_v40 = vadd.f32 %v1565_v35, %v1037_v30  ;;  %v957_v41 = vrot.slane %v952_v29, %v2820_v36  ;;  %v961_v42 = vrot.slane %v952_v29, %v2822_v37  ;;  %v965_v43 = vrot.slane %v952_v29, %v2824_v38 }
 0x198   : > { %v969_v2 = vrot.slane %v952_v29, %v2826_v39  ;;  %v982_v48 = vrot.slane %v978_v47, %v2820_v36  ;;  %v990_v51 = vrot.slane %v978_v47, %v2824_v38  ;;  %v986_v53 = vrot.slane %v978_v47, %v2822_v37 }
 0x199   : > { %1044 = vst.msk [vmem:[%s2815_s6] sm:$0xf] %vm1042_vm3, %v1039_v40  ;;  %v970_v44 = vcombine.low %v957_v41, %v961_v42  ;;  %v994_v55 = vrot.slane %v978_v47, %v2826_v39 }
 0x19a   : > { %v971_v45 = vcombine.low %v965_v43, %v969_v2  ;;  %vm2840_vm14 = vcmp.eq.s32.totalorder %v982_v48, 1  ;;  %vm997_vm1 = vcmp.eq.s32.totalorder %v990_v51, 1  ;;  %vm996_vm4 = vcmp.eq.s32.totalorder %v986_v53, 1 }
 0x19b   : > { %1656 = vrcp.f32 %v970_v44  ;;  %vm998_vm13 = vcmp.eq.s32.totalorder %v994_v55, 1 }
 0x19c   : > { %1658 = vrcp.f32 %v971_v45 }
 0x1a0   : > { %v1053_v20 = vld [vmem:[%s2815_s6] sm:$0xf] (%p1045_p6) }
 0x1a1   : > { %vm1054_vm15 = vcmp.gt.f32.partialorder (%p1045_p6), %v1053_v20, 0.0 }
 0x1a2   : > { %v1058_v25 = vsel (%p1045_p6), %vm1054_vm15, %v1053_v20, 1.0  ;;  %v1096_v21 = vsel (%p1045_p6), %vm1054_vm15, 1, %v1776_v19 }
 0x1a3   : > { %v1063_v31 = vrot.slane (%p1045_p6), %v1058_v25, %v2820_v36  ;;  %v1067_v32 = vrot.slane (%p1045_p6), %v1058_v25, %v2822_v37  ;;  %v1071_v33 = vrot.slane (%p1045_p6), %v1058_v25, %v2824_v38  ;;  %v1075_v34 = vrot.slane (%p1045_p6), %v1058_v25, %v2826_v39 }
 0x1a4   : > { %v1100_v24 = vrot.slane (%p1045_p6), %v1096_v21, %v2820_v36  ;;  %v1104_v27 = vrot.slane (%p1045_p6), %v1096_v21, %v2822_v37  ;;  %v1108_v28 = vrot.slane (%p1045_p6), %v1096_v21, %v2824_v38  ;;  %v1112_v23 = vrot.slane (%p1045_p6), %v1096_v21, %v2826_v39 }
 0x1a5   : > { %v1076_v4 = vcombine.low (%p1045_p6), %v1063_v31, %v1067_v32  ;;  %v1077_v6 = vcombine.low (%p1045_p6), %v1071_v33, %v1075_v34 }
 0x1a6   : > { %vm1113_vm7 = vcmp.eq.s32.totalorder (%p1045_p6), %v1100_v24, 1  ;;  %vm1114_vm9 = vcmp.eq.s32.totalorder (%p1045_p6), %v1104_v27, 1  ;;  %vm1115_vm8 = vcmp.eq.s32.totalorder (%p1045_p6), %v1108_v28, 1  ;;  %vm1116_vm11 = vcmp.eq.s32.totalorder (%p1045_p6), %v1112_v23, 1 }
 0x1a7   : > { %v1084_v15 = vrot.slane (%p1045_p6), %v1076_v4, %v1023_v3  ;;  %v1091_v16 = vrot.slane (%p1045_p6), %v1077_v6, %v1023_v3 }
 0x1a8   : > { %v1657_v56 = vpop.eup %1656 }
 0x1a9   : > { %v1659_v59 = vpop.eup %1658  ;;  %v975_v60 = vmul.f32 %v1657_v56, %v947_v52  ;;  %v1092_v17 = vcombine.low (%p1045_p6), %v1084_v15, %v1091_v16 }
 0x1aa   : > { %v977_v61 = vmul.f32 %v1659_v59, %v948_v54 }
 0x1ab   : > { %v1001_v62 = vcombine.high %v975_v60, %v975_v60  ;;  %v1005_v63 = vsel %vm2840_vm14, %v975_v60, 0.0  ;;  %1660 = vrcp.f32 (%p1045_p6), %v1092_v17 }
 0x1ac   : > { %v1002_v0 = vcombine.high %v977_v61, %v977_v61  ;;  %v1007_v1 = vsel %vm997_vm1, %v977_v61, 0.0 }
 0x1ad   : > { %v1006_v5 = vsel %vm996_vm4, %v1001_v62, 0.0 }
 0x1ae   : > { %v1008_v7 = vsel %vm998_vm13, %v1002_v0, 0.0  ;;  %v1016_v8 = vcombine.low %v1005_v63, %v1006_v5 }
 0x1af   : > { %v1017_v9 = vcombine.low %v1007_v1, %v1008_v7 }
 0x1b0   : > { %v1024_v12 = vrot.slane %v1016_v8, %v1023_v3 }
 0x1b1   : > { %v1031_v13 = vrot.slane %v1017_v9, %v1023_v3 }
 0x1b3   : > { %v1032_v10 = vcombine.low %v1024_v12, %v1031_v13  ;;  %1049 = sbr.rel (!%p1045_p6) target bundleno = 463 (0x1cf), region = 48 }
 0x1b5   : > { %v1034_v11 = vadd.f32 %v1032_v10, %v1011_v14 }
 0x1b7   : > { %1035 = vst [vmem:[%s1010_s14] sm:$0xff] %v1034_v11 }
 0x1b8   : > { %v1661_v26 = vpop.eup %1660 }
 0x1be   : > { %v1057_v22 = vld [vmem:[%s1010_s14] sm:$0xff] }
 0x1bf   : > { %v1095_v18 = vmul.f32 %v1661_v26, %v1057_v22 }
 0x1c1   : > { %v1118_v29 = vcombine.high %v1095_v18, %v1095_v18  ;;  %v1125_v30 = vrot.slane %v1095_v18, %v1023_v3 }
 0x1c3   : > { %v1132_v35 = vrot.slane %v1118_v29, %v1023_v3  ;;  %v1133_v40 = vcombine.high %v1125_v30, %v1125_v30  ;;  %v1139_v41 = vsel %vm1113_vm7, %v1125_v30, 0.0 }
 0x1c5   : > { %v1134_v42 = vcombine.high %v1132_v35, %v1132_v35  ;;  %v1140_v36 = vsel %vm1114_vm9, %v1133_v40, 0.0  ;;  %v1141_v43 = vsel %vm1115_vm8, %v1132_v35, 0.0 }
 0x1c6   : > { %v1147_v2 = vcombine.low %v1139_v41, %v1140_v36 }
 0x1c7   : > { %v1142_v37 = vsel %vm1116_vm11, %v1134_v42, 0.0 }
 0x1c8   : > { %v1148_v44 = vcombine.low %v1141_v43, %v1142_v37  ;;  %v1155_v38 = vrot.slane %v1147_v2, %v1023_v3 }
 0x1ca   : > { %v1162_v45 = vrot.slane %v1148_v44, %v1023_v3 }
 0x1cc   : > { %v1163_v46 = vcombine.low %v1155_v38, %v1162_v45 }
 0x1ce   : > { %1165 = vst [vmem:[%s197_s25] sm:$0xff] %v1163_v46 }
 0x1cf PF: > { %s1576_s20 = sshll.u32 %s1752_s19, 7  ;;  %s1181_s9 = sshll.u32 %s197_s25, 4  ;;  %s1182_s9 = int_to_ptr.vmem [resolvable:$true] %s1181_s9 }
 0x1d0   : > { %s1179_s29 = scalar_lea.hbm %s2911_s3, %s1576_s20  ;;  %s2968_s10 = sand.u32 1, %s1744_s18  }
 0x1d1   : > { %s1167_s11 = scalar_lea.sflag [#allocation8], %s2968_s10  ;;  %s1674_s12 = scalar_lea.vmem %s1182_s9, 128 }
 0x1d2   : > { %p1675_p7 = scmp.ne.s32.totalorder %s1182_s9, %s1674_s12  ;;  %s1777_s13 = smov [#allocation7]  }
 0x1d3   : > { %s1678_s15 = sshll.u32 %s1777_s13, 4  ;;  %s1679_s15 = int_to_ptr.vmem [resolvable:$false] %s1678_s15 }
 0x1d4   : > { %p1676_p9 = pnand %p1675_p7, %p1853_p8  ;;  %s1680_s16 = scalar_lea.vmem %s1679_s15, 256 }
 0x1d5   : > { %p1681_p11 = scmp.lt.s32.totalorder %s1182_s9, %s1679_s15  ;;  %p1682_p12 = scmp.lt.s32.totalorder %s1680_s16, %s1674_s12 }
 0x1d6   : > { %p1677_p10 = pneg %p1676_p9 }
 0x1d7   : > { %p1683_p0 = por %p1682_p12, %p1681_p11 }
 0x1d9   : > { %p1684_p1 = pnand %p1683_p0, %p1677_p10 }
 0x1db   : > { %1687 = shalt.err (!%p1684_p1)
}
 0x1dc   : > { %s1688_s19 = scalar_lea.hbm %s1179_s29, 128  ;;  %s1692_s6 = scalar_lea.hbm %s2911_s3, 512 }
 0x1dd   : > { %p1689_p2 = scmp.ne.s32.totalorder %s1179_s29, %s1688_s19  ;;  %p1693_p5 = scmp.lt.s32.totalorder %s1179_s29, %s2911_s3 }
 0x1de   : > { %p1694_p6 = scmp.lt.s32.totalorder %s1692_s6, %s1688_s19 }
 0x1df   : > { %p1690_p3 = pnand %p1689_p2, %p1853_p8 }
 0x1e0   : > { %p1695_p7 = por %p1694_p6, %p1693_p5 }
 0x1e1   : > { %p1691_p4 = pneg %p1690_p3 }
 0x1e3   : > { %p1696_p9 = pnand %p1695_p7, %p1691_p4 }
 0x1e5   : > { %1699 = shalt.err (!%p1696_p9)
}
 0x1e6   : > { %1577 = dma.vmem_to_hbm [thread:$0]  (%p1853_p8), %s1182_s9, 128, %s1179_s29, %s1167_s11  }
 0x1e7 PF: > { %p1583_p10 = scmp.ge.s32.totalorder %s1768_s23, 2  ;;  %s1193_s20 = sand.u32 1, %s1740_s17  }
 0x1e8   : > { %s1194_s24 = scalar_lea.sflag [#allocation8], %s1193_s20 }
 0x1e9   : > { %p1580_p11 = pnand %p1583_p10, %p1864_p13 }
 0x1eb   : > { %p1581_p12 = pneg %p1580_p11 }
 0x1ed   : > { %1735 = dma.done.wait (%p1581_p12), %s1194_s24, 128  }
 0x1ee   : > { %1737 = vsyncadd (%p1581_p12), %s1194_s24, 4294967168  ;;  %s22_s23 = sadd.s32 1, %s1768_s23   ;;  %s2969_s17 = smov %s1744_s18 }
 0x1ef   : > { %p19_p0 = scmp.ge.s32.totalorder %s22_s23, 18   ;;  %s2970_s18 = smov %s1748_s0 }
 0x1f0   : > { %s2971_s0 = smov %s1862_s4  ;;  %s2972_s19 = smov %s1760_s21 }
 0x1f1   : > { %s2973_s20 = smov %s1764_s22  ;;  %s2974_s21 = smov %s2977_s26 }
 0x1f2   : > { %s2975_s22 = smov %s2981_s27  ;;  %21 = sbr.rel (!%p19_p0) target bundleno = 20 (0x14), region = 96 }
 0x1f7   :  { %1199 = vsyncpa [#allocation8], 1 }
 0x1f8   :  { %1201 = vsyncpa [#allocation8 + $0x1], 1 }

</bundles_post_ra>
